<compile_context>
chip_gen: v7x
topology: tpu7x:2x2x1
jax: 0.10.0
libtpu: 0.0.40
codegen_flags: <defaults>
</compile_context>

<pallas_src>
import jax
import jax.numpy as jnp
from jax.experimental import pallas as pl
from jax.experimental.pallas import tpu as pltpu


def biatt_kernel(bias_ref, c_ref, q_ref, w_ref, out_ref):
    # bias_ref: SMEM (1,) = b_c + b_q + b_cq (pre-summed on host)
    c = c_ref[...]                      # (TB, c_len, D)
    q = q_ref[...]                      # (TB, q_len, D)
    w = w_ref[...]                      # (3, D): rows = w_c, w_q, w_cq
    wc = w[0:1, :]                      # (1, D)
    wq = w[1:2, :]
    wcq = w[2:3, :]
    bias_total = bias_ref[0]            # scalar

    # Skinny projections on the VPU + lane reduce (keep the MXU free).
    sc = jnp.sum(c * wc, axis=-1, keepdims=True) + bias_total      # (TB, c_len, 1)
    sq = jnp.sum(q * wq, axis=-1, keepdims=True)                   # (TB, q_len, 1)
    sq_t = jnp.swapaxes(sq, 1, 2)                                  # (TB, 1, q_len)

    # Similarity matrix: fold w_cq into q (q_len << c_len), contract last dims.
    qs = q * wcq                                                   # (TB, q_len, D)
    s = jnp.einsum("bcd,bqd->bcq", c, qs,
                   preferred_element_type=jnp.float32)             # (TB, c_len, q_len)
    s = s + sc + sq_t

    # context -> query softmax (over q_len)
    row_max = jnp.max(s, axis=2, keepdims=True)                    # (TB, c_len, 1)
    e = jnp.exp(s - row_max)
    a = e * pl.reciprocal(jnp.sum(e, axis=2, keepdims=True), approx=True)
    c2q = jnp.einsum("bcq,bqd->bcd", a, q,
                     preferred_element_type=jnp.float32)           # (TB, c_len, D)

    # query -> context softmax over c_len of max_q(s); weighted sum on VPU+XLU.
    m = jnp.max(row_max, axis=1, keepdims=True)                    # (TB, 1, 1)
    be = jnp.exp(row_max - m)                                      # (TB, c_len, 1)
    bw = be * pl.reciprocal(jnp.sum(be, axis=1, keepdims=True), approx=True)
    q2c = jnp.sum(bw * c, axis=1, keepdims=True)                   # (TB, 1, D)

    # Fused lane-dense output: one (TB, c_len, 4*D) store per tile.
    od = out_ref.dtype
    fused = jnp.concatenate(
        [c.astype(od), c2q.astype(od),
         (c * c2q).astype(od), (c * q2c).astype(od)], axis=-1)     # (TB, c_len, 4D)
    out_ref[...] = fused


def _pick_tb(B, batch_block):
    """Largest batch tile that divides B; prefer >= 2 grid steps (v7x 2 TCs)."""
    cap = max(1, min(batch_block, B))
    two_step = [tb for tb in range(1, cap + 1) if B % tb == 0 and B // tb >= 2]
    if two_step:
        return max(two_step)
    return max(tb for tb in range(1, cap + 1) if B % tb == 0)


def biatt_pallas(c, q, w_c, b_c, w_q, b_q, w_cq, b_cq, *, batch_block=8):
    B, c_len, D = c.shape
    _, q_len, _ = q.shape
    out_dtype = c.dtype

    # No batch padding pass: TB always divides B.
    TB = _pick_tb(B, batch_block)
    n_tiles = B // TB

    # Stack the three (1, D) projection weights into one resident (3, D) tile.
    w_stack = jnp.concatenate(
        [w_c.reshape(1, D), w_q.reshape(1, D), w_cq.reshape(1, D)],
        axis=0).astype(jnp.float32)
    # Pre-sum the three biases into a single SMEM scalar.
    bias = (b_c.reshape(()) + b_q.reshape(()) + b_cq.reshape(())) \
        .astype(jnp.float32).reshape(1)

    # Scoped-VMEM budget: double-buffered input tiles + output tile + headroom.
    in_bytes = (TB * c_len * D + TB * q_len * D) * jnp.dtype(c.dtype).itemsize
    out_bytes = TB * c_len * 4 * D * jnp.dtype(out_dtype).itemsize
    vmem_limit = int(min(max(4 * (in_bytes + out_bytes) + (1 << 20), 32 << 20),
                         100 << 20))

    grid_spec = pltpu.PrefetchScalarGridSpec(
        num_scalar_prefetch=0,
        grid=(n_tiles,),
        in_specs=[
            pl.BlockSpec(memory_space=pltpu.MemorySpace.SMEM),      # bias (1,)
            pl.BlockSpec((TB, c_len, D), lambda i: (i, 0, 0)),      # c
            pl.BlockSpec((TB, q_len, D), lambda i: (i, 0, 0)),      # q
            pl.BlockSpec((3, D), lambda i: (0, 0)),                 # w_c/w_q/w_cq
        ],
        out_specs=pl.BlockSpec((TB, c_len, 4 * D), lambda i: (i, 0, 0)),
    )

    out = pl.pallas_call(
        biatt_kernel,
        out_shape=jax.ShapeDtypeStruct((B, c_len, 4 * D), out_dtype),
        grid_spec=grid_spec,
        compiler_params=pltpu.CompilerParams(
            dimension_semantics=("parallel",),
            vmem_limit_bytes=vmem_limit,
        ),
    )(bias, c, q, w_stack)
    return out


def biatt_ref(c, q, w_c, b_c, w_q, b_q, w_cq, b_cq):
    """Pure-JAX reference mirroring the PyTorch forward."""
    D = c.shape[-1]
    sc = c @ w_c.reshape(D, 1) + b_c                                # (B, c_len, 1)
    sq = q @ w_q.reshape(D, 1) + b_q                                # (B, q_len, 1)
    cq = jnp.einsum("bcd,bqd->bcq", c * w_cq.reshape(1, 1, D), q) + b_cq
    s = sc + jnp.swapaxes(sq, 1, 2) + cq                            # (B, c_len, q_len)
    a = jax.nn.softmax(s, axis=2)
    c2q = jnp.einsum("bcq,bqd->bcd", a, q)
    b = jax.nn.softmax(jnp.max(s, axis=2), axis=1)                  # (B, c_len)
    q2c = jnp.einsum("bc,bcd->bd", b, c)[:, None, :]
    q2c = jnp.broadcast_to(q2c, c.shape)
    return jnp.concatenate([c, c2q, c * c2q, c * q2c], axis=-1)


if __name__ == "__main__":
    hidden_size = 16          # D = 2*hidden = 32, output feature = 8*hidden = 128
    B, c_len, q_len = 2, 16, 8
    D = 2 * hidden_size

    key = jax.random.PRNGKey(0)
    kc, kq, k1, k2, k3, k4, k5, k6 = jax.random.split(key, 8)
    c = jax.random.normal(kc, (B, c_len, D), dtype=jnp.float32)
    q = jax.random.normal(kq, (B, q_len, D), dtype=jnp.float32)

    # deterministic parameter init (Linear(2H, 1) -> weight (1, 2H), bias (1,))
    w_c = jax.random.normal(k1, (1, D), dtype=jnp.float32) * 0.1
    b_c = jax.random.normal(k2, (1,), dtype=jnp.float32) * 0.1
    w_q = jax.random.normal(k3, (1, D), dtype=jnp.float32) * 0.1
    b_q = jax.random.normal(k4, (1,), dtype=jnp.float32) * 0.1
    w_cq = jax.random.normal(k5, (1, D), dtype=jnp.float32) * 0.1
    b_cq = jax.random.normal(k6, (1,), dtype=jnp.float32) * 0.1

    out = biatt_pallas(c, q, w_c, b_c, w_q, b_q, w_cq, b_cq)
    out = jax.block_until_ready(out)

    ref = biatt_ref(c, q, w_c, b_c, w_q, b_q, w_cq, b_cq)
    assert out.shape == (B, c_len, 4 * D), out.shape
    # approx reciprocal in the softmax denominators slightly loosens tolerance
    assert jnp.allclose(out, ref, atol=5e-3, rtol=5e-3), (
        float(jnp.max(jnp.abs(out - ref)))
    )
    print("KERNEL_OK")
</pallas_src>

<mosaic_0001>
module attributes {stable_mosaic.version = 11 : i64} {
  func.func @biatt_kernel(%arg0: i32, %arg1: memref<1xf32, #tpu.memory_space<smem>>, %arg2: memref<1x16x32xf32, #tpu.memory_space<vmem>>, %arg3: memref<1x8x32xf32, #tpu.memory_space<vmem>>, %arg4: memref<3x32xf32, #tpu.memory_space<vmem>>, %arg5: memref<1x16x128xf32, #tpu.memory_space<vmem>>) attributes {dimension_semantics = [#tpu.dimension_semantics<parallel>], iteration_bounds = array<i64: 2>, scalar_prefetch = 0 : i64, scratch_operands = 0 : i64, tpu.core_type = #tpu.core_type<tc>, window_params = [{transform_indices = @transform_0, window_bounds = array<i64: 1>}, {transform_indices = @transform_1, window_bounds = array<i64: 1, 16, 32>}, {transform_indices = @transform_2, window_bounds = array<i64: 1, 8, 32>}, {pipeline_mode = #tpu.pipeline_mode<synchronous>, transform_indices = @transform_3, window_bounds = array<i64: 3, 32>}, {transform_indices = @transform_4, window_bounds = array<i64: 1, 16, 128>}]} {
    %c0 = arith.constant 0 : index
    %c0_0 = arith.constant 0 : index
    %c0_1 = arith.constant 0 : index
    %0 = vector.load %arg2[%c0, %c0_0, %c0_1] : memref<1x16x32xf32, #tpu.memory_space<vmem>>, vector<1x16x32xf32>
    %c0_2 = arith.constant 0 : index
    %c0_3 = arith.constant 0 : index
    %c0_4 = arith.constant 0 : index
    %1 = vector.load %arg3[%c0_2, %c0_3, %c0_4] : memref<1x8x32xf32, #tpu.memory_space<vmem>>, vector<1x8x32xf32>
    %c0_5 = arith.constant 0 : index
    %c0_6 = arith.constant 0 : index
    %2 = vector.load %arg4[%c0_5, %c0_6] : memref<3x32xf32, #tpu.memory_space<vmem>>, vector<3x32xf32>
    %3 = vector.extract_strided_slice %2 {offsets = [0, 0], sizes = [1, 32], strides = [1, 1]} : vector<3x32xf32> to vector<1x32xf32>
    %4 = vector.extract_strided_slice %2 {offsets = [1, 0], sizes = [1, 32], strides = [1, 1]} : vector<3x32xf32> to vector<1x32xf32>
    %5 = vector.extract_strided_slice %2 {offsets = [2, 0], sizes = [1, 32], strides = [1, 1]} : vector<3x32xf32> to vector<1x32xf32>
    %c0_7 = arith.constant 0 : index
    %6 = memref.load %arg1[%c0_7] : memref<1xf32, #tpu.memory_space<smem>>
    %7 = vector.shape_cast %3 : vector<1x32xf32> to vector<1x1x32xf32>
    %8 = vector.broadcast %7 : vector<1x1x32xf32> to vector<1x16x32xf32>
    %9 = arith.mulf %0, %8 : vector<1x16x32xf32>
    %cst = arith.constant dense<0.000000e+00> : vector<1x16xf32>
    %10 = vector.multi_reduction <add>, %9, %cst [2] : vector<1x16x32xf32> to vector<1x16xf32>
    %11 = vector.shape_cast %10 : vector<1x16xf32> to vector<1x16x1xf32>
    %12 = vector.broadcast %6 : f32 to vector<1x16x1xf32>
    %13 = arith.addf %11, %12 : vector<1x16x1xf32>
    %14 = vector.shape_cast %4 : vector<1x32xf32> to vector<1x1x32xf32>
    %15 = vector.broadcast %14 : vector<1x1x32xf32> to vector<1x8x32xf32>
    %16 = arith.mulf %1, %15 : vector<1x8x32xf32>
    %cst_8 = arith.constant dense<0.000000e+00> : vector<1x8xf32>
    %17 = vector.multi_reduction <add>, %16, %cst_8 [2] : vector<1x8x32xf32> to vector<1x8xf32>
    %18 = vector.shape_cast %17 : vector<1x8xf32> to vector<1x8x1xf32>
    %19 = tpu.transpose %18, [0, 2, 1] : vector<1x8x1xf32> -> vector<1x1x8xf32>
    %20 = vector.shape_cast %5 : vector<1x32xf32> to vector<1x1x32xf32>
    %21 = vector.broadcast %20 : vector<1x1x32xf32> to vector<1x8x32xf32>
    %22 = arith.mulf %1, %21 : vector<1x8x32xf32>
    "tpu.trace_start"() <{level = 10 : i32, message = "bcd,bqd->bcq"}> : () -> ()
    %cst_9 = arith.constant dense<0.000000e+00> : vector<1x16x8xf32>
    %23 = tpu.matmul %0, %22, %cst_9 {dimension_numbers = #tpu.dot_dimension_numbers<[2], [2], [1], [1], [0, 0, 0, 1, 1, 1], [0], [0]>} : vector<1x16x32xf32>, vector<1x8x32xf32>, vector<1x16x8xf32> -> vector<1x16x8xf32>
    "tpu.trace_stop"() : () -> ()
    %24 = vector.broadcast %13 : vector<1x16x1xf32> to vector<1x16x8xf32>
    %25 = arith.addf %23, %24 : vector<1x16x8xf32>
    %26 = vector.broadcast %19 : vector<1x1x8xf32> to vector<1x16x8xf32>
    %27 = arith.addf %25, %26 : vector<1x16x8xf32>
    %cst_10 = arith.constant dense<0xFF800000> : vector<1x16xf32>
    %28 = vector.multi_reduction <maximumf>, %27, %cst_10 [2] : vector<1x16x8xf32> to vector<1x16xf32>
    %29 = vector.shape_cast %28 : vector<1x16xf32> to vector<1x16x1xf32>
    %30 = vector.broadcast %29 : vector<1x16x1xf32> to vector<1x16x8xf32>
    %31 = arith.subf %27, %30 : vector<1x16x8xf32>
    %32 = math.exp %31 : vector<1x16x8xf32>
    %cst_11 = arith.constant dense<0.000000e+00> : vector<1x16xf32>
    %33 = vector.multi_reduction <add>, %32, %cst_11 [2] : vector<1x16x8xf32> to vector<1x16xf32>
    %34 = vector.shape_cast %33 : vector<1x16xf32> to vector<1x16x1xf32>
    %35 = tpu.reciprocal %34 {approx = true} : vector<1x16x1xf32> -> vector<1x16x1xf32>
    %36 = vector.broadcast %35 : vector<1x16x1xf32> to vector<1x16x8xf32>
    %37 = arith.mulf %32, %36 : vector<1x16x8xf32>
    "tpu.trace_start"() <{level = 10 : i32, message = "bcq,bqd->bcd"}> : () -> ()
    %cst_12 = arith.constant dense<0.000000e+00> : vector<1x16x32xf32>
    %38 = tpu.matmul %37, %1, %cst_12 {dimension_numbers = #tpu.dot_dimension_numbers<[2], [1], [1], [2], [0, 0, 0, 1, 1, 2], [0], [0]>} : vector<1x16x8xf32>, vector<1x8x32xf32>, vector<1x16x32xf32> -> vector<1x16x32xf32>
    "tpu.trace_stop"() : () -> ()
    %cst_13 = arith.constant dense<0xFF800000> : vector<1x1xf32>
    %39 = vector.multi_reduction <maximumf>, %29, %cst_13 [1] : vector<1x16x1xf32> to vector<1x1xf32>
    %40 = vector.shape_cast %39 : vector<1x1xf32> to vector<1x1x1xf32>
    %41 = vector.broadcast %40 : vector<1x1x1xf32> to vector<1x16x1xf32>
    %42 = arith.subf %29, %41 : vector<1x16x1xf32>
    %43 = math.exp %42 : vector<1x16x1xf32>
    %cst_14 = arith.constant dense<0.000000e+00> : vector<1x1xf32>
    %44 = vector.multi_reduction <add>, %43, %cst_14 [1] : vector<1x16x1xf32> to vector<1x1xf32>
    %45 = vector.shape_cast %44 : vector<1x1xf32> to vector<1x1x1xf32>
    %46 = tpu.reciprocal %45 {approx = true} : vector<1x1x1xf32> -> vector<1x1x1xf32>
    %47 = vector.broadcast %46 : vector<1x1x1xf32> to vector<1x16x1xf32>
    %48 = arith.mulf %43, %47 : vector<1x16x1xf32>
    %49 = vector.broadcast %48 : vector<1x16x1xf32> to vector<1x16x32xf32>
    %50 = arith.mulf %49, %0 : vector<1x16x32xf32>
    %cst_15 = arith.constant dense<0.000000e+00> : vector<1x32xf32>
    %51 = vector.multi_reduction <add>, %50, %cst_15 [1] : vector<1x16x32xf32> to vector<1x32xf32>
    %52 = vector.shape_cast %51 : vector<1x32xf32> to vector<1x1x32xf32>
    %53 = arith.mulf %0, %38 : vector<1x16x32xf32>
    %54 = vector.broadcast %52 : vector<1x1x32xf32> to vector<1x16x32xf32>
    %55 = arith.mulf %0, %54 : vector<1x16x32xf32>
    %56 = tpu.concatenate %0, %38, %53, %55 in 2 : vector<1x16x32xf32>, vector<1x16x32xf32>, vector<1x16x32xf32>, vector<1x16x32xf32> -> vector<1x16x128xf32>
    %c0_16 = arith.constant 0 : index
    %c0_17 = arith.constant 0 : index
    %c0_18 = arith.constant 0 : index
    %57 = vector.load %arg5[%c0_16, %c0_17, %c0_18] : memref<1x16x128xf32, #tpu.memory_space<vmem>>, vector<1x16x128xf32>
    tpu.vector_store %arg5[%c0_16, %c0_17, %c0_18], %56 {strides = array<i32>} : memref<1x16x128xf32, #tpu.memory_space<vmem>>, vector<1x16x128xf32>,
    return
  }
  func.func @transform_0(%arg0: i32) -> i32 {
    %c0_i32 = arith.constant 0 : i32
    %c0_i32_0 = arith.constant 0 : i32
    return %c0_i32 : i32
  }
  func.func @transform_1(%arg0: i32) -> (i32, i32, i32) {
    %c0_i32 = arith.constant 0 : i32
    %c0_i32_0 = arith.constant 0 : i32
    %c0_i32_1 = arith.constant 0 : i32
    return %arg0, %c0_i32, %c0_i32_0 : i32, i32, i32
  }
  func.func @transform_2(%arg0: i32) -> (i32, i32, i32) {
    %c0_i32 = arith.constant 0 : i32
    %c0_i32_0 = arith.constant 0 : i32
    %c0_i32_1 = arith.constant 0 : i32
    return %arg0, %c0_i32, %c0_i32_0 : i32, i32, i32
  }
  func.func @transform_3(%arg0: i32) -> (i32, i32) {
    %c0_i32 = arith.constant 0 : i32
    %c0_i32_0 = arith.constant 0 : i32
    %c0_i32_1 = arith.constant 0 : i32
    return %c0_i32, %c0_i32_0 : i32, i32
  }
  func.func @transform_4(%arg0: i32) -> (i32, i32, i32) {
    %c0_i32 = arith.constant 0 : i32
    %c0_i32_0 = arith.constant 0 : i32
    %c0_i32_1 = arith.constant 0 : i32
    return %arg0, %c0_i32, %c0_i32_0 : i32, i32, i32
  }
}

</mosaic_0001>

<bundles_post_ra>
// kernel: tpu_custom_call.1
= control target key start
LH: loop header
LB: loop body
LE: loop exit
PB: predicated region body
PF: predicated region fallthrough
CT: control target
= control target key end

     0   :  { %s1225_s0 = inlined_call_operand.<no memory space> [shape: f32[1], index: 0, kind: input, shape index: {}]   ;;  %s1226_s1 = inlined_call_operand.hbm [shape: f32[2,16,32], index: 1, kind: input, shape index: {}]   ;;  %s1227_s2 = inlined_call_operand.hbm [shape: f32[2,8,32], index: 2, kind: input, shape index: {}]   ;;  %s1228_s3 = inlined_call_operand.vmem [shape: f32[3,32], index: 3, kind: input, shape index: {}]   ;;  %s1229_s4 = inlined_call_operand.hbm [shape: f32[2,16,128], index: 4, kind: output, shape index: {}]  }
   0x1   :  { %9 = sst [smem:[#allocation2]] %s1225_s0 }
   0x2   :  { %10 = vsyncpa [#allocation4], 0 }
   0x3   :  { %12 = vsyncpa [#allocation4 + $0x1], 0 }
   0x4   :  { %13 = vsyncpa [#allocation7], 0 }
   0x5   :  { %15 = vsyncpa [#allocation7 + $0x1], 0 }
   0x6   :  { %16 = vsyncpa [#allocation5], 0 }
   0x7   :  { %18 = vsyncpa [#allocation5 + $0x1], 0  ;;  %s979_s17 = smov 0   ;;  %s981_s18 = smov 0  }
   0x8   :  { %s983_s19 = smov 0   ;;  %s985_s20 = smov 0  }
   0x9 LB: > { %s1000_s0 = sadd.s32 4294967295, %s939_s20   ;;  %s696_s21 = sadd.s32 4294967294, %s939_s20   ;;  %s939_s20 = sphi %s985_s20, %s1246_s20   ;;  %s935_s19 = sphi %s983_s19, %s1245_s19   ;;  %s931_s18 = sphi %s981_s18, %s1244_s18   ;;  %s927_s17 = sphi %s979_s17, %s1243_s17  }
   0xa   : > { %s1004_s22 = sadd.s32 1, %s939_s20   ;;  %s52_s23 = sadd.s32 1, %s935_s19 }
   0xb   : > { %s49_s24 = ssub.s32 %s939_s20, %s1004_s22  ;;  %p59_p0 = scmp.ne.s32.totalorder %s935_s19, %s931_s18 }
   0xc   : > { %p50_p1 = scmp.eq.s32.totalorder %s49_s24, 0  ;;  %p60_p2 = scmp.eq.s32.totalorder %s939_s20, 0 }
   0xd   : > { %p65_p3 = scmp.ne.s32.totalorder %s931_s18, %s927_s17  ;;  %p66_p4 = scmp.eq.s32.totalorder %s1000_s0, 0 }
   0xe   : > { %s1016_s25 = scalar_select %p50_p1, %s935_s19, %s52_s23  }
   0xf   : > { %p1018_p5 = por %p60_p2, %p59_p0  ;;  %p1022_p6 = por %p66_p4, %p65_p3 }
  0x10   : > { %p136_p7 = scmp.eq.s32.totalorder %s1000_s0, 1  ;;  %p142_p8 = scmp.eq.s32.totalorder %s696_s21, 1 }
  0x11   : > { %s1233_s27 = scalar_select %p1022_p6, 1, 0 }
  0x12   : > { %p753_p10 = scmp.lt.s32.totalorder %s939_s20, 2  ;;  %p1029_p11 = por %p136_p7, %p59_p0 }
  0x13   : > { %p1033_p12 = por %p142_p8, %p65_p3  ;;  %s1038_s30 = sand.u32 1, %s935_s19  }
  0x14   : > { %s1234_s28 = scalar_select %p1029_p11, 1, 0 }
  0x15   : > { %s1235_s29 = scalar_select %p1033_p12, 1, 0 }
  0x16   : > { %s718_s5 = sshll.u32 %s939_s20, 8  ;;  %s699_s6 = sshll.u32 %s1038_s30, 4 }
  0x17   : > { %s1045_s9 = scalar_lea.hbm %s1226_s1, %s718_s5  ;;  %s172_s10 = scalar_lea.vmem [#allocation3], %s699_s6 }
  0x18   : > { %s179_s11 = sshll.u32 %s172_s10, 4  ;;  %p1049_p13 = pnand %p753_p10, %p1018_p5  ;;  %s1053_s11 = int_to_ptr.vmem [resolvable:$true] %s179_s11 }
  0x19   : > { %s169_s13 = scalar_lea.sflag [#allocation4], %s1038_s30  ;;  %s809_s14 = scalar_lea.hbm %s1045_s9, 256 }
  0x1a   : > { %p810_p0 = scmp.ne.s32.totalorder %s1045_s9, %s809_s14  ;;  %p811_p1 = pneg %p1049_p13 }
  0x1b   : > { %s814_s21 = scalar_lea.hbm %s1226_s1, 512  ;;  %p815_p4 = scmp.lt.u32.totalorder %s1045_s9, %s1226_s1 }
  0x1c   : > { %p812_p2 = pnand %p811_p1, %p810_p0  ;;  %p816_p5 = scmp.lt.u32.totalorder %s814_s21, %s809_s14 }
  0x1d   : > { %p818_p8 = scmp.lt.u32.totalorder %s809_s14, %s1045_s9 }
  0x1e   : > { %p813_p3 = pneg %p812_p2  ;;  %p817_p7 = por %p816_p5, %p815_p4 }
  0x20   : > { %p819_p10 = por %p818_p8, %p817_p7 }
  0x22   : > { %p820_p9 = pnand %p819_p10, %p813_p3 }
  0x24   : > { %823 = shalt.err (!%p820_p9)
}
  0x25   : > { %s824_s26 = scalar_lea.vmem %s1053_s11, 256  ;;  %s941_s5 = smov [#allocation3]  }
  0x26   : > { %p825_p0 = scmp.ne.s32.totalorder %s1053_s11, %s824_s26  ;;  %s829_s6 = sshll.u32 %s941_s5, 4  ;;  %s830_s6 = int_to_ptr.vmem [resolvable:$false] %s829_s6 }
  0x27   : > { %s831_s7 = scalar_lea.vmem %s830_s6, 512  ;;  %p832_p11 = scmp.lt.s32.totalorder %s1053_s11, %s830_s6 }
  0x28   : > { %p827_p2 = pnand %p825_p0, %p811_p1  ;;  %p833_p4 = scmp.lt.s32.totalorder %s831_s7, %s824_s26 }
  0x2a   : > { %p828_p12 = pneg %p827_p2  ;;  %p834_p5 = por %p833_p4, %p832_p11 }
  0x2c   : > { %p835_p7 = pnand %p834_p5, %p828_p12 }
  0x2e   : > { %838 = shalt.err (!%p835_p7)
}
  0x2f   : > { %s942_s8 = smov 128   ;;  %s943_s10 = smov 8  }
  0x30   : > { %745 = dma.hbm_to_vmem [thread:$0]  (!%p1049_p13), %s1045_s9, 256, %s1053_s11, %s169_s13, %s942_s8, %s942_s8, %s943_s10  }
  0x31   : > { %p704_p9 = scmp.ge.s32.totalorder %s939_s20, 1  ;;  %p205_p3 = scmp.lt.s32.totalorder %s939_s20, 3 }
  0x32   : > { %s702_s14 = sshll.u32 %s1038_s30, 3  ;;  %s703_s16 = sshll.u32 %s939_s20, 7 }
  0x33   : > { %p1086_p11 = pnand %p704_p9, %p205_p3  ;;  %s193_s21 = scalar_lea.vmem [#allocation6], %s702_s14 }
  0x34   : > { %s200_s23 = sshll.u32 %s193_s21, 4  ;;  %s1094_s5 = scalar_lea.hbm %s1227_s2, %s703_s16  ;;  %s201_s23 = int_to_ptr.vmem [resolvable:$true] %s200_s23 }
  0x35   : > { %s1237_s15 = scalar_select %p1086_p11, 1, 0 }
  0x36   : > { %s190_s9 = scalar_lea.sflag [#allocation7], %s1038_s30  ;;  %s839_s11 = scalar_lea.hbm %s1094_s5, 128 }
  0x37   : > { %p840_p12 = scmp.ne.s32.totalorder %s1094_s5, %s839_s11  ;;  %s844_s7 = scalar_lea.hbm %s1227_s2, 256 }
  0x38   : > { %p845_p0 = scmp.lt.u32.totalorder %s1094_s5, %s1227_s2  ;;  %p846_p2 = scmp.lt.u32.totalorder %s844_s7, %s839_s11 }
  0x39   : > { %p842_p8 = pnand %p840_p12, %p811_p1  ;;  %p848_p5 = scmp.lt.u32.totalorder %s839_s11, %s1094_s5 }
  0x3a   : > { %p847_p4 = por %p846_p2, %p845_p0 }
  0x3b   : > { %p843_p10 = pneg %p842_p8 }
  0x3c   : > { %p849_p7 = por %p848_p5, %p847_p4 }
  0x3e   : > { %p850_p9 = pnand %p849_p7, %p843_p10 }
  0x40   : > { %853 = shalt.err (!%p850_p9)
}
  0x41   : > { %s854_s30 = scalar_lea.vmem %s201_s23, 128  ;;  %s944_s14 = smov [#allocation6]  }
  0x42   : > { %p855_p3 = scmp.ne.s32.totalorder %s201_s23, %s854_s30  ;;  %s859_s16 = sshll.u32 %s944_s14, 4  ;;  %s860_s16 = int_to_ptr.vmem [resolvable:$false] %s859_s16 }
  0x43   : > { %s861_s21 = scalar_lea.vmem %s860_s16, 256  ;;  %p862_p6 = scmp.lt.s32.totalorder %s201_s23, %s860_s16 }
  0x44   : > { %p857_p12 = pnand %p855_p3, %p811_p1  ;;  %p863_p11 = scmp.lt.s32.totalorder %s861_s21, %s854_s30 }
  0x46   : > { %p858_p8 = pneg %p857_p12  ;;  %p864_p0 = por %p863_p11, %p862_p6 }
  0x48   : > { %p865_p2 = pnand %p864_p0, %p858_p8 }
  0x4a   : > { %868 = shalt.err (!%p865_p2)
}
  0x4b   : > { %748 = dma.hbm_to_vmem [thread:$0]  (!%p1049_p13), %s1094_s5, 128, %s201_s23, %s190_s9  }
  0x4c   : > { %p1238_p10 = scmp.ne.s32.totalorder %s1237_s15, 0 }
  0x4d   : > { %s1119_s24 = sand.u32 (!%p1238_p10), 1, %s931_s18   ;;  %p1239_p6 = scmp.ne.s32.totalorder (!%p1238_p10), %s1233_s27, 0 }
  0x4e   : > { %209 = sbr.rel (%p1238_p10) target bundleno = 1052 (0x41c), region = 36  ;;  %s705_s26 = sshll.u32 (!%p1238_p10), %s1119_s24, 4 }
  0x4f   : > { %s212_s11 = scalar_lea.sflag (!%p1238_p10), [#allocation4], %s1119_s24  ;;  %s215_s13 = scalar_lea.vmem (!%p1238_p10), [#allocation3], %s705_s26 }
  0x55   : > { %914 = dma.done.wait (%p1239_p6), %s212_s11, 256  }
  0x56   : > { %916 = vsyncadd (%p1239_p6), %s212_s11, 4294967040  ;;  %s706_s12 = sshll.u32 %s1119_s24, 3  ;;  %s221_s15 = scalar_lea.sflag [#allocation7], %s1119_s24 }
  0x57   : > { %s224_s23 = scalar_lea.vmem [#allocation6], %s706_s12 }
  0x58   : > { %918 = dma.done.wait (%p1239_p6), %s221_s15, 128  }
  0x59   : > { %920 = vsyncadd (%p1239_p6), %s221_s15, 4294967168  ;;  %v259_v0 = vlaneseq  ;;  %v256_v5 = vld [vmem:[%s224_s23] sm:$0xff]  ;;  %vm265_vm0 = vcmask 261120   ;;  %v1142_v11 = vld [vmem:[%s215_s13 + $0x8] sm:$0xff]  ;;  %s258_s27 = sld [smem:[#allocation2]]  ;;  %vm410_vm1 = vcmask 64512  }
  0x5a   : > { %v257_v6 = vld [vmem:[%s1228_s3] sm:$0x7]  ;;  %731 = vmatprep.subr.mxu1 %v256_v5  ;;  %s945_s6 = smov 96   ;;  %s946_s7 = smov 32   ;;  %vm581_vm2 = vcmask 785408   ;;  %vm578_vm3 = vcmask 523264  }
  0x5b   : > { %v260_v1 = vshrl.u32 %v259_v0, 7  ;;  %v1138_v7 = vld [vmem:[%s215_s13] sm:$0xff]  ;;  %732 = vmatpush3.msra.mxu1 %v256_v5  ;;  %s947_s8 = smov 64   ;;  %s253_s10 = scalar_lea.vmem [#allocation8], %s705_s26 }
  0x5c   : > { %728 = vmatprep.mubr.msk.f32.mxu0 %vm265_vm0, %v1138_v7  ;;  %s600_s30 = sshll.u32 %s253_s10, 4  ;;  %s719_s14 = sshll.u32 %s1000_s0, 8  ;;  %s1172_s30 = int_to_ptr.vmem [resolvable:$true] %s600_s30 }
  0x5d   : > { %v277_v2 = vsub.s32 1, %v260_v1  ;;  %v317_v3 = vsub.s32 2, %v260_v1  ;;  %v261_v4 = vsub.s32 0, %v260_v1  ;;  %s1180_s26 = scalar_lea.hbm %s1229_s4, %s719_s14  ;;  %s587_s0 = scalar_lea.sflag [#allocation5], %s1119_s24 }
  0x5e   : > { %s869_s11 = scalar_lea.vmem %s1172_s30, 256  ;;  %p1240_p1 = scmp.ne.s32.totalorder %s1234_s28, 0 }
  0x5f   : > { %v278_v8 = vrot.slane %v257_v6, %v277_v2  ;;  %v318_v9 = vrot.slane %v257_v6, %v317_v3  ;;  %v262_v10 = vrot.slane %v257_v6, %v261_v4  ;;  %v272_v23 = vstv %s258_s27  ;;  %p870_p13 = scmp.ne.s32.totalorder %s1172_s30, %s869_s11  ;;  %s948_s13 = smov [#allocation8]  }
  0x60   : > { %s873_s12 = sshll.u32 %s948_s13, 4  ;;  %s874_s12 = int_to_ptr.vmem [resolvable:$false] %s873_s12 }
  0x61   : > { %v279_v12 = vmul.f32 %v278_v8, %v256_v5  ;;  %v319_v13 = vmul.f32 %v318_v9, %v256_v5  ;;  %v264_v14 = vmul.f32 %v262_v10, %v1142_v11  ;;  %v263_v15 = vmul.f32 %v262_v10, %v1138_v7  ;;  %p871_p11 = pnand %p870_p13, %p1240_p1  ;;  %s875_s15 = scalar_lea.vmem %s874_s12, 512 }
  0x62   : > { %p876_p5 = scmp.lt.s32.totalorder %s1172_s30, %s874_s12  ;;  %p877_p7 = scmp.lt.s32.totalorder %s875_s15, %s869_s11 }
  0x63   : > { %v280_v16 = vsel %vm265_vm0, %v279_v12, 0.0  ;;  %726 = vmatprep.subr.msk.mxu0 %vm265_vm0, %v319_v13  ;;  %v269_v17 = vsel %vm265_vm0, %v264_v14, 0.0  ;;  %v266_v18 = vsel %vm265_vm0, %v263_v15, 0.0  ;;  %p872_p4 = pneg %p871_p11 }
  0x64   : > { %281 = vadd.xlane.f32.xlu0 %v280_v16  ;;  %727 = vmatpush3.xpose.msk.msra.mxu0 %vm265_vm0, %v319_v13  ;;  %p878_p9 = por %p877_p7, %p876_p5 }
  0x65   : > { %270 = vadd.xlane.f32.xlu1 %v269_v17 }
  0x66   : > { %p879_p3 = pnand %p878_p9, %p872_p4 }
  0x67   : > { %729 = vmatmul.mubr.msk.f32.vlgmr.msra.gmra.mrb[0].mxu0 %vm265_vm0, %v1142_v11 }
  0x68   : > { %267 = vadd.xlane.f32.xlu0 %v266_v18 }
  0xf1   : > { %v282_v19 = vpop.xlane.xlu0 %281 }
  0xf2   : > { %283 = vxpose.xlu1.b32.start.end [1/1] (short) (narrow) %v282_v19, 8  ;;  %v271_v25 = vpop.xlane.xlu1 %270 }
  0xf3   : > { %v274_v26 = vadd.f32 %v272_v23, %v271_v25 }
  0xf5   : > { %v268_v22 = vpop.xlane.xlu0 %267 }
  0xf6   : > { %v273_v24 = vadd.f32 %v272_v23, %v268_v22 }
 0x13a   : > { %v730_v20 = vpop.f32.mrb[0].mxu0 }
 0x13b   : > { %v395_v21 = vpop.f32.mrb[1].mxu0  ;;  %v401_v30 = vadd.f32 %v730_v20, %v274_v26 }
 0x13c   : > { %v396_v27 = vadd.f32 %v395_v21, %v273_v24 }
 0x172   : > { %v299_v28 = vpop.trf.xlu1 }
 0x173   : > { %v407_v29 = vrot.slane %v299_v28, %v261_v4 }
 0x175   : > { %v408_v31 = vadd.f32 %v407_v29, %v396_v27  ;;  %v409_v33 = vadd.f32 %v407_v29, %v401_v30 }
 0x177   : > { %v411_v32 = vsel %vm410_vm1, %v408_v31, -inf  ;;  %v414_v34 = vsel %vm410_vm1, %v409_v33, -inf }
 0x178   : > { %412 = vmax.xlane.f32.xlu0 %v411_v32 }
 0x17c   : > { %415 = vmax.xlane.f32.xlu0 %v414_v34 }
 0x205   : > { %v413_v35 = vpop.xlane.xlu0 %412 }
 0x206   : > { %v417_v36 = vsub.f32 %v408_v31, %v413_v35 }
 0x208   : > { %v419_v37 = vmul.f32 1.442695, %v417_v36 }
 0x209   : > { %v416_v38 = vpop.xlane.xlu0 %415 }
 0x20a   : > { %795 = vpow2.f32 %v419_v37  ;;  %v418_v39 = vsub.f32 %v409_v33, %v416_v38  ;;  %v514_v40 = vmax.f32 %v413_v35, %v416_v38 }
 0x20c   : > { %v421_v41 = vmul.f32 1.442695, %v418_v39  ;;  %v515_v42 = vrot.slane %v514_v40, 4 }
 0x20e   : > { %797 = vpow2.f32 %v421_v41  ;;  %v516_v43 = vmax.f32 %v514_v40, %v515_v42 }
 0x210   : > { %v517_v44 = vrot.slane %v516_v43, 2 }
 0x212   : > { %v518_v45 = vmax.f32 %v516_v43, %v517_v44 }
 0x214   : > { %v796_v46 = vpop.eup %795  ;;  %v519_v47 = vrot.slane %v518_v45, 1 }
 0x215   : > { %v423_v48 = vsel %vm410_vm1, %v796_v46, 0.0 }
 0x216   : > { %v520_v49 = vmax.f32 %v518_v45, %v519_v47  ;;  %424 = vadd.xlane.f32.xlu0 %v423_v48 }
 0x218   : > { %v798_v50 = vpop.eup %797  ;;  %v521_v51 = vsub.f32 %v413_v35, %v520_v49  ;;  %v522_v52 = vsub.f32 %v416_v38, %v520_v49 }
 0x219   : > { %v426_v53 = vsel %vm410_vm1, %v798_v50, 0.0 }
 0x21a   : > { %v523_v54 = vmul.f32 1.442695, %v521_v51  ;;  %v525_v55 = vmul.f32 1.442695, %v522_v52  ;;  %427 = vadd.xlane.f32.xlu0 %v426_v53 }
 0x21c   : > { %799 = vpow2.f32 %v523_v54 }
 0x21d   : > { %801 = vpow2.f32 %v525_v55 }
 0x226   : > { %v800_v56 = vpop.eup %799 }
 0x227   : > { %v802_v57 = vpop.eup %801 }
 0x228   : > { %v527_v58 = vadd.f32 %v802_v57, %v800_v56 }
 0x22a   : > { %v528_v59 = vrot.slane %v527_v58, 4 }
 0x22c   : > { %v529_v60 = vadd.f32 %v528_v59, %v527_v58 }
 0x22e   : > { %v530_v61 = vrot.slane %v529_v60, 2 }
 0x230   : > { %v531_v62 = vadd.f32 %v530_v61, %v529_v60 }
 0x232   : > { %v532_v63 = vrot.slane %v531_v62, 1 }
 0x234   : > { %v533_v0 = vadd.f32 %v532_v63, %v531_v62 }
 0x236   : > { %803 = vrcp.f32 %v533_v0 }
 0x240   : > { %v804_v1 = vpop.eup %803 }
 0x241   : > { %v536_v2 = vmul.f32 %v804_v1, %v802_v57  ;;  %v535_v3 = vmul.f32 %v804_v1, %v800_v56 }
 0x243   : > { %v537_v4 = vmul.f32 %v535_v3, %v1138_v7  ;;  %v538_v5 = vmul.f32 %v536_v2, %v1142_v11 }
 0x245   : > { %v539_v6 = vsel %vm265_vm0, %v537_v4, 0.0  ;;  %v540_v8 = vsel %vm265_vm0, %v538_v5, 0.0 }
 0x246   : > { %v541_v9 = vadd.f32 %v540_v8, %v539_v6 }
 0x248   : > { %v542_v10 = vrot.slane %v541_v9, 4 }
 0x24a   : > { %v543_v12 = vadd.f32 %v542_v10, %v541_v9 }
 0x24c   : > { %v544_v13 = vrot.slane %v543_v12, 2 }
 0x24e   : > { %v545_v14 = vadd.f32 %v544_v13, %v543_v12 }
 0x250   : > { %v546_v15 = vrot.slane %v545_v14, 1 }
 0x252   : > { %v547_v16 = vadd.f32 %v546_v15, %v545_v14 }
 0x254   : > { %v550_v17 = vmul.f32 %v547_v16, %v1138_v7  ;;  %v551_v28 = vmul.f32 %v547_v16, %v1142_v11 }
 0x256   : > { %570 = vrot.lane.b32.xlu1 %v550_v17, %s945_s6 }
 0x2a3   : > { %v425_v18 = vpop.xlane.xlu0 %424 }
 0x2a4   : > { %805 = vrcp.f32 %v425_v18 }
 0x2a7   : > { %v428_v19 = vpop.xlane.xlu0 %427 }
 0x2a8   : > { %807 = vrcp.f32 %v428_v19 }
 0x2ae   : > { %v806_v20 = vpop.eup %805 }
 0x2af   : > { %v431_v21 = vmul.f32 %v806_v20, %v796_v46 }
 0x2b1   : > { %733 = vmatprep.mubr.msk.f32.mxu1 %vm410_vm1, %v431_v21 }
 0x2b2   : > { %v808_v22 = vpop.eup %807 }
 0x2b3   : > { %v432_v23 = vmul.f32 %v808_v22, %v798_v50 }
 0x2b5   : > { %734 = vmatmul.mubr.msk.f32.vlgmr.msra.gmra.mrb[0].mxu1 %vm410_vm1, %v432_v23 }
 0x2c8   : > { %v571_v34 = vpop.permute.xlu1 %570 }
 0x388   : > { %v735_v24 = vpop.f32.mrb[0].mxu1 }
 0x389   : > { %556 = vrot.lane.b32.xlu0 %v735_v24, %s946_s7  ;;  %v505_v25 = vpop.f32.mrb[1].mxu1  ;;  %v549_v26 = vmul.f32 %v735_v24, %v1142_v11 }
 0x38a   : > { %v548_v27 = vmul.f32 %v505_v25, %v1138_v7 }
 0x38d   : > { %554 = vrot.lane.b32.xlu0 %v505_v25, %s946_s7 }
 0x391   : > { %564 = vrot.lane.b32.xlu0 %v549_v26, %s947_s8 }
 0x395   : > { %562 = vrot.lane.b32.xlu0 %v548_v27, %s947_s8 }
 0x399   : > { %572 = vrot.lane.b32.xlu0 %v551_v28, %s945_s6 }
 0x3fb   : > { %v557_v29 = vpop.permute.xlu0 %556 }
 0x3fc   : > { %v577_v37 = vsel %vm265_vm0, %v1142_v11, %v557_v29 }
 0x3ff   : > { %v555_v30 = vpop.permute.xlu0 %554 }
 0x400   : > { %v576_v32 = vsel %vm265_vm0, %v1138_v7, %v555_v30 }
 0x403   : > { %v565_v31 = vpop.permute.xlu0 %564 }
 0x404   : > { %v580_v7 = vsel %vm578_vm3, %v577_v37, %v565_v31 }
 0x407   : > { %v563_v33 = vpop.permute.xlu0 %562 }
 0x408   : > { %v579_v35 = vsel %vm578_vm3, %v576_v32, %v563_v33 }
 0x409   : > { %v582_v36 = vsel %vm581_vm2, %v579_v35, %v571_v34 }
 0x40a   : > { %584 = vst [vmem:[%s253_s10] sm:$0xff] %v582_v36 }
 0x40b   : > { %v573_v38 = vpop.permute.xlu0 %572 }
 0x40c   : > { %v583_v39 = vsel %vm581_vm2, %v580_v7, %v573_v38 }
 0x40d   : > { %585 = vst [vmem:[%s253_s10 + $0x8] sm:$0xff] %v583_v39 }
 0x40e   : > { %882 = shalt.err (!%p879_p3)
}
 0x40f   : > { %s883_s23 = scalar_lea.hbm %s1180_s26, 256  ;;  %s887_s27 = scalar_lea.hbm %s1229_s4, 512 }
 0x410   : > { %p884_p12 = scmp.ne.s32.totalorder %s1180_s26, %s883_s23  ;;  %p888_p2 = scmp.lt.u32.totalorder %s1180_s26, %s1229_s4 }
 0x411   : > { %p889_p10 = scmp.lt.u32.totalorder %s887_s27, %s883_s23  ;;  %p891_p13 = scmp.lt.u32.totalorder %s883_s23, %s1180_s26 }
 0x412   : > { %p885_p8 = pnand %p884_p12, %p1240_p1 }
 0x413   : > { %p890_p6 = por %p889_p10, %p888_p2 }
 0x414   : > { %p886_p0 = pneg %p885_p8 }
 0x415   : > { %p892_p11 = por %p891_p13, %p890_p6 }
 0x417   : > { %p893_p4 = pnand %p892_p11, %p886_p0 }
 0x419   : > { %896 = shalt.err (!%p893_p4)
}
 0x41a   : > { %s949_s8 = smov 128   ;;  %s950_s10 = smov 8  }
 0x41b   : > { %740 = dma.vmem_to_hbm [thread:$0]  (%p1240_p1), %s1172_s30, 256, %s1180_s26, %s587_s0, %s949_s8, %s949_s8, %s950_s10  }
 0x41c PF: > { %s615_s14 = sand.u32 1, %s927_s17   ;;  %p1241_p5 = scmp.ne.s32.totalorder %s1235_s29, 0 }
 0x41d   : > { %p1242_p7 = scmp.ge.s32.totalorder %s939_s20, 2  ;;  %s616_s16 = scalar_lea.sflag [#allocation5], %s615_s14 }
 0x41f   : > { %p750_p9 = pnand %p1242_p7, %p1241_p5 }
 0x421   : > { %922 = dma.done.wait (!%p750_p9), %s616_s16, 256  }
 0x422   : > { %924 = vsyncadd (!%p750_p9), %s616_s16, 4294967040  ;;  %p21_p3 = scmp.ge.s32.totalorder %s1004_s22, 4   ;;  %s1243_s17 = smov %s931_s18 }
 0x423   : > { %s1244_s18 = smov %s935_s19  ;;  %s1245_s19 = smov %s1016_s25 }
 0x424   : > { %s1246_s20 = smov %s1004_s22  ;;  %23 = sbr.rel (!%p21_p3) target bundleno = 9 (0x9), region = 94 }
 0x42b   :  { %621 = vsyncpa [#allocation4], 1 }
 0x42c   :  { %623 = vsyncpa [#allocation4 + $0x1], 1 }
 0x42d   :  { %624 = vsyncpa [#allocation7], 1 }
 0x42e   :  { %626 = vsyncpa [#allocation7 + $0x1], 1 }
 0x42f   :  { %627 = vsyncpa [#allocation5], 1 }
 0x430   :  { %629 = vsyncpa [#allocation5 + $0x1], 1 }

</bundles_post_ra>
